<compile_context>
chip_gen: v6e
topology: v6e:2x2x1
jax: 0.10.0
libtpu: 0.0.40
codegen_flags: <defaults>
</compile_context>

<pallas_src>
import jax
import jax.numpy as jnp
from jax.experimental import pallas as pl
from jax.experimental.pallas import tpu as pltpu


# --------------------------------------------------------------------------
# Kernels
# --------------------------------------------------------------------------
def ssm_step_kernel(x_ref, u_ref, wx_ref, wu_ref, b_ref, o_ref):
    # Two MXU contractions (K = nx and K = nu) + broadcast bias add.
    acc = jnp.dot(x_ref[...], wx_ref[...], preferred_element_type=jnp.float32)
    acc = acc + jnp.dot(u_ref[...], wu_ref[...],
                        preferred_element_type=jnp.float32)
    o_ref[...] = (acc + b_ref[...]).astype(o_ref.dtype)


def ssm_rollout_kernel(x0_ref, u_ref, wx_ref, wu_ref, b_ref, xs_ref, state_ref):
    # Grid = (batch_tiles [parallel], T [arbitrary]); recurrent state lives in
    # a VMEM scratch that persists across the T axis.
    t = pl.program_id(1)

    @pl.when(t == 0)
    def _init():
        state_ref[...] = x0_ref[...].astype(jnp.float32)

    x = state_ref[...]
    nxt = (jnp.dot(x, wx_ref[...], preferred_element_type=jnp.float32)
           + jnp.dot(u_ref[...], wu_ref[...], preferred_element_type=jnp.float32)
           + b_ref[...])
    state_ref[...] = nxt
    xs_ref[...] = nxt.astype(xs_ref.dtype)


# --------------------------------------------------------------------------
# Parameter setup
# --------------------------------------------------------------------------
def ssm_prepare_params(wx, wu, bx, bu, *, torch_layout=True,
                       param_dtype=jnp.float32):
    """One-time parameter setup.

    torch_layout=True: wx (nx, nx) and wu (nx, nu) are given in nn.Linear's
    (out_features, in_features) layout and are explicitly transposed to
    (in_features, out_features) for the kernel's x @ W contraction.
    The two biases are fused: fx(x) + fu(u) has a single additive (bx + bu).
    """
    if torch_layout:
        wx = wx.T            # (nx, nx)
        wu = wu.T            # (nu, nx)
    nx = wx.shape[1]
    assert wx.shape == (nx, nx), f"Wx must be square, got {wx.shape}"
    assert wu.shape[1] == nx, f"Wu out dim {wu.shape[1]} != nx {nx}"
    # TODO(synk): at larger nx/nu/B switch param_dtype to bfloat16 (keep the
    # f32 MXU accumulate); f32 kept here so the toy correctness check is exact.
    w_x = wx.astype(param_dtype)
    w_u = wu.astype(param_dtype)
    b = (bx + bu).astype(jnp.float32).reshape(1, nx)
    return w_x, w_u, b


def _pick_bm(B, bm_max):
    """Batch-tile rows: multiple of 8 (f32 sublane), as large as allowed, and
    when the batch is non-trivial split into >= 2 tiles so the v7x second
    TensorCore has work under dimension_semantics=("parallel", ...)."""
    if B <= 16:
        return B                      # single tile; too small to split
    if B <= bm_max:
        half = -(-B // 2)             # cdiv(B, 2)
        return min(B, ((half + 7) // 8) * 8)
    return bm_max


# --------------------------------------------------------------------------
# Wrappers
# --------------------------------------------------------------------------
def ssm_forward(x, u, wx, wu, b, *, bm_max=512):
    """Single SSM step (== module forward).  x:(B,nx) u:(B,nu) -> (B,nx)."""
    B, nx = x.shape
    nu = u.shape[1]
    bm = _pick_bm(B, bm_max)
    grid = (pl.cdiv(B, bm),)

    return pl.pallas_call(
        ssm_step_kernel,
        out_shape=jax.ShapeDtypeStruct((B, nx), x.dtype),
        grid=grid,
        in_specs=[
            # Streamed activations: one tile per batch grid step.
            pl.BlockSpec((bm, nx), lambda i: (i, 0)),
            pl.BlockSpec((bm, nu), lambda i: (i, 0)),
            # Weights / bias: constant block index -> DMA'd once, VMEM-resident.
            pl.BlockSpec((nx, nx), lambda i: (0, 0)),
            pl.BlockSpec((nu, nx), lambda i: (0, 0)),
            pl.BlockSpec((1, nx), lambda i: (0, 0)),
        ],
        out_specs=pl.BlockSpec((bm, nx), lambda i: (i, 0)),
        compiler_params=pltpu.CompilerParams(
            dimension_semantics=("parallel",),
        ),
    )(x, u, wx, wu, b)


def ssm_rollout(x0, u_seq, wx, wu, b, *, bm_max=512):
    """Full prediction horizon in ONE kernel.

    x0:(B,nx)  u_seq:(T,B,nu)  ->  xs:(T,B,nx) with xs[t] = state after step t.
    """
    B, nx = x0.shape
    T, _, nu = u_seq.shape
    bm = _pick_bm(B, bm_max)
    grid = (pl.cdiv(B, bm), T)        # T innermost, recurrent -> "arbitrary"

    return pl.pallas_call(
        ssm_rollout_kernel,
        out_shape=jax.ShapeDtypeStruct((T, B, nx), x0.dtype),
        grid=grid,
        in_specs=[
            # Initial state: constant across T (read only at t == 0).
            pl.BlockSpec((bm, nx), lambda i, t: (i, 0)),
            # Controls: one (bm, nu) slab streamed per time step.
            pl.BlockSpec((None, bm, nu), lambda i, t: (t, i, 0)),
            # Weights / bias: constant index_map -> fetched once, resident
            # across the whole rollout.
            pl.BlockSpec((nx, nx), lambda i, t: (0, 0)),
            pl.BlockSpec((nu, nx), lambda i, t: (0, 0)),
            pl.BlockSpec((1, nx), lambda i, t: (0, 0)),
        ],
        out_specs=pl.BlockSpec((None, bm, nx), lambda i, t: (t, i, 0)),
        scratch_shapes=[pltpu.VMEM((bm, nx), jnp.float32)],   # recurrent state
        compiler_params=pltpu.CompilerParams(
            dimension_semantics=("parallel", "arbitrary"),
        ),
    )(x0, u_seq, wx, wu, b)


# --------------------------------------------------------------------------
# Self-test
# --------------------------------------------------------------------------
if __name__ == "__main__":
    # Small shapes consistent with the module: batch=8, nx=32, nu=16, T=12.
    B, nx, nu, T = 8, 32, 16, 12

    key = jax.random.PRNGKey(0)
    kx, ku, kwx, kwu, kbx, kbu, kus = jax.random.split(key, 7)

    # nn.Linear-style parameters in TORCH layout: (out_features, in_features).
    lim_x = 1.0 / jnp.sqrt(nx)
    lim_u = 1.0 / jnp.sqrt(nu)
    wx_t = jax.random.uniform(kwx, (nx, nx), jnp.float32, -lim_x, lim_x)
    wu_t = jax.random.uniform(kwu, (nx, nu), jnp.float32, -lim_u, lim_u)
    bx = jax.random.uniform(kbx, (nx,), jnp.float32, -lim_x, lim_x)
    bu = jax.random.uniform(kbu, (nx,), jnp.float32, -lim_u, lim_u)

    x = jax.random.normal(kx, (B, nx), jnp.float32)
    u = jax.random.normal(ku, (B, nu), jnp.float32)
    u_seq = jax.random.normal(kus, (T, B, nu), jnp.float32)

    # One-time parameter setup (torch -> (in, out) layout, fused bias).
    wx, wu, b = ssm_prepare_params(wx_t, wu_t, bx, bu, torch_layout=True)

    # --- single SSM step (matches the module's forward) ---
    out = jax.block_until_ready(ssm_forward(x, u, wx, wu, b))
    ref = x @ wx_t.T + bx + u @ wu_t.T + bu
    assert out.shape == (B, nx)
    assert jnp.allclose(out, ref, atol=1e-4, rtol=1e-4), "step mismatch"

    # --- full prediction horizon fused into one kernel ---
    xs = jax.block_until_ready(ssm_rollout(x, u_seq, wx, wu, b))
    x_cur = x
    refs = []
    for t in range(T):
        x_cur = x_cur @ wx_t.T + bx + u_seq[t] @ wu_t.T + bu
        refs.append(x_cur)
    xs_ref = jnp.stack(refs, axis=0)
    assert xs.shape == (T, B, nx)
    assert jnp.allclose(xs, xs_ref, atol=1e-3, rtol=1e-3), "rollout mismatch"

    print("KERNEL_OK")
</pallas_src>

<mosaic_0001>
module attributes {stable_mosaic.version = 11 : i64} {
  func.func @ssm_step_kernel(%arg0: i32, %arg1: memref<8x32xf32, #tpu.memory_space<vmem>>, %arg2: memref<8x16xf32, #tpu.memory_space<vmem>>, %arg3: memref<32x32xf32, #tpu.memory_space<vmem>>, %arg4: memref<16x32xf32, #tpu.memory_space<vmem>>, %arg5: memref<1x32xf32, #tpu.memory_space<vmem>>, %arg6: memref<8x32xf32, #tpu.memory_space<vmem>>) attributes {dimension_semantics = [#tpu.dimension_semantics<parallel>], iteration_bounds = array<i64: 1>, scalar_prefetch = 0 : i64, scratch_operands = 0 : i64, tpu.core_type = #tpu.core_type<tc>, window_params = [{transform_indices = @transform_0, window_bounds = array<i64: 8, 32>}, {transform_indices = @transform_1, window_bounds = array<i64: 8, 16>}, {pipeline_mode = #tpu.pipeline_mode<synchronous>, transform_indices = @transform_2, window_bounds = array<i64: 32, 32>}, {pipeline_mode = #tpu.pipeline_mode<synchronous>, transform_indices = @transform_3, window_bounds = array<i64: 16, 32>}, {pipeline_mode = #tpu.pipeline_mode<synchronous>, transform_indices = @transform_4, window_bounds = array<i64: 1, 32>}, {transform_indices = @transform_5, window_bounds = array<i64: 8, 32>}]} {
    %c0 = arith.constant 0 : index
    %c0_0 = arith.constant 0 : index
    %0 = vector.load %arg1[%c0, %c0_0] : memref<8x32xf32, #tpu.memory_space<vmem>>, vector<8x32xf32>
    %c0_1 = arith.constant 0 : index
    %c0_2 = arith.constant 0 : index
    %1 = vector.load %arg3[%c0_1, %c0_2] : memref<32x32xf32, #tpu.memory_space<vmem>>, vector<32x32xf32>
    %cst = arith.constant dense<0.000000e+00> : vector<8x32xf32>
    %2 = tpu.matmul %0, %1, %cst {dimension_numbers = #tpu.dot_dimension_numbers<[1], [0], [0], [1], [0, 0, 1, 1], [], []>} : vector<8x32xf32>, vector<32x32xf32>, vector<8x32xf32> -> vector<8x32xf32>
    %c0_3 = arith.constant 0 : index
    %c0_4 = arith.constant 0 : index
    %3 = vector.load %arg2[%c0_3, %c0_4] : memref<8x16xf32, #tpu.memory_space<vmem>>, vector<8x16xf32>
    %c0_5 = arith.constant 0 : index
    %c0_6 = arith.constant 0 : index
    %4 = vector.load %arg4[%c0_5, %c0_6] : memref<16x32xf32, #tpu.memory_space<vmem>>, vector<16x32xf32>
    %cst_7 = arith.constant dense<0.000000e+00> : vector<8x32xf32>
    %5 = tpu.matmul %3, %4, %cst_7 {dimension_numbers = #tpu.dot_dimension_numbers<[1], [0], [0], [1], [0, 0, 1, 1], [], []>} : vector<8x16xf32>, vector<16x32xf32>, vector<8x32xf32> -> vector<8x32xf32>
    %6 = arith.addf %2, %5 : vector<8x32xf32>
    %c0_8 = arith.constant 0 : index
    %c0_9 = arith.constant 0 : index
    %7 = vector.load %arg5[%c0_8, %c0_9] : memref<1x32xf32, #tpu.memory_space<vmem>>, vector<1x32xf32>
    %8 = vector.broadcast %7 : vector<1x32xf32> to vector<8x32xf32>
    %9 = arith.addf %6, %8 : vector<8x32xf32>
    %c0_10 = arith.constant 0 : index
    %c0_11 = arith.constant 0 : index
    %10 = vector.load %arg6[%c0_10, %c0_11] : memref<8x32xf32, #tpu.memory_space<vmem>>, vector<8x32xf32>
    tpu.vector_store %arg6[%c0_10, %c0_11], %9 {strides = array<i32>} : memref<8x32xf32, #tpu.memory_space<vmem>>, vector<8x32xf32>,
    return
  }
  func.func @transform_0(%arg0: i32) -> (i32, i32) {
    %c0_i32 = arith.constant 0 : i32
    %c0_i32_0 = arith.constant 0 : i32
    return %arg0, %c0_i32 : i32, i32
  }
  func.func @transform_1(%arg0: i32) -> (i32, i32) {
    %c0_i32 = arith.constant 0 : i32
    %c0_i32_0 = arith.constant 0 : i32
    return %arg0, %c0_i32 : i32, i32
  }
  func.func @transform_2(%arg0: i32) -> (i32, i32) {
    %c0_i32 = arith.constant 0 : i32
    %c0_i32_0 = arith.constant 0 : i32
    %c0_i32_1 = arith.constant 0 : i32
    return %c0_i32, %c0_i32_0 : i32, i32
  }
  func.func @transform_3(%arg0: i32) -> (i32, i32) {
    %c0_i32 = arith.constant 0 : i32
    %c0_i32_0 = arith.constant 0 : i32
    %c0_i32_1 = arith.constant 0 : i32
    return %c0_i32, %c0_i32_0 : i32, i32
  }
  func.func @transform_4(%arg0: i32) -> (i32, i32) {
    %c0_i32 = arith.constant 0 : i32
    %c0_i32_0 = arith.constant 0 : i32
    %c0_i32_1 = arith.constant 0 : i32
    return %c0_i32, %c0_i32_0 : i32, i32
  }
  func.func @transform_5(%arg0: i32) -> (i32, i32) {
    %c0_i32 = arith.constant 0 : i32
    %c0_i32_0 = arith.constant 0 : i32
    return %arg0, %c0_i32 : i32, i32
  }
}

</mosaic_0001>

<bundles_post_ra>
// kernel: tpu_custom_call.1
= control target key start
LH: loop header
LB: loop body
LE: loop exit
PB: predicated region body
PF: predicated region fallthrough
CT: control target
= control target key end

     0   :  { %10 = vsyncpa [#allocation3], 0  ;;  %s457_s0 = inlined_call_operand.hbm [shape: f32[8,32], index: 0, kind: input, shape index: {}]   ;;  %s458_s1 = inlined_call_operand.hbm [shape: f32[8,16], index: 1, kind: input, shape index: {}]   ;;  %s459_s2 = inlined_call_operand.hbm [shape: f32[32,32], index: 2, kind: input, shape index: {}]   ;;  %s460_s3 = inlined_call_operand.hbm [shape: f32[16,32], index: 3, kind: input, shape index: {}]   ;;  %s461_s4 = inlined_call_operand.vmem [shape: f32[1,32], index: 4, kind: input, shape index: {}]   ;;  %s462_s5 = inlined_call_operand.hbm [shape: f32[8,32], index: 5, kind: output, shape index: {}]  }
   0x1   :  { %11 = vsyncpa [#allocation6], 0 }
   0x2   :  { %12 = vsyncpa [#allocation9], 0 }
   0x3   :  { %13 = vsyncpa [#allocation4], 0  ;;  %s400_s18 = smov [#allocation5]   ;;  %s401_s20 = smov [#allocation2]  }
   0x4   :  { %s30_s19 = sshll.u32 %s400_s18, 4  ;;  %s20_s21 = sshll.u32 %s401_s20, 4  ;;  %s31_s19 = int_to_ptr.vmem [resolvable:$true] %s30_s19  ;;  %s21_s21 = int_to_ptr.vmem [resolvable:$true] %s20_s21 }
   0x5   :  { %s300_s22 = scalar_lea.vmem %s31_s19, 128  ;;  %p305_p1 = scmp.lt.s32.totalorder %s31_s19, %s31_s19 }
   0x6   :  { %p301_p0 = scmp.ne.s32.totalorder %s31_s19, %s300_s22  ;;  %p306_p2 = scmp.lt.s32.totalorder %s300_s22, %s300_s22 }
   0x8   :  { %p307_p3 = por %p306_p2, %p305_p1 }
   0xa   :  { %p308_p4 = pnand %p307_p3, %p301_p0 }
   0xc   :  { %311 = shalt.err (!%p308_p4)
}
   0xd   :  { %33 = dma.hbm_to_vmem [thread:$0]  %s458_s1, 128, %s31_s19, [#allocation6]  }
   0xe   :  { %s320_s25 = scalar_lea.vmem %s21_s21, 128  ;;  %p325_p6 = scmp.lt.s32.totalorder %s21_s21, %s21_s21 }
   0xf   :  { %p321_p5 = scmp.ne.s32.totalorder %s21_s21, %s320_s25  ;;  %p326_p7 = scmp.lt.s32.totalorder %s320_s25, %s320_s25 }
  0x11   :  { %p327_p8 = por %p326_p7, %p325_p6 }
  0x13   :  { %p328_p9 = pnand %p327_p8, %p321_p5 }
  0x15   :  { %331 = shalt.err (!%p328_p9)
}
  0x16   :  { %23 = dma.hbm_to_vmem [thread:$0]  %s457_s0, 128, %s21_s21, [#allocation3]  }
  0x17   :  { %s402_s28 = smov [#allocation7]  }
  0x18   :  { %s39_s29 = sshll.u32 %s402_s28, 4  ;;  %s40_s29 = int_to_ptr.vmem [resolvable:$true] %s39_s29 }
  0x19   :  { %s340_s30 = scalar_lea.vmem %s40_s29, 512  ;;  %p345_p11 = scmp.lt.s32.totalorder %s40_s29, %s40_s29 }
  0x1a   :  { %p341_p10 = scmp.ne.s32.totalorder %s40_s29, %s340_s30  ;;  %p346_p12 = scmp.lt.s32.totalorder %s340_s30, %s340_s30 }
  0x1c   :  { %p347_p13 = por %p346_p12, %p345_p11 }
  0x1e   :  { %p348_p0 = pnand %p347_p13, %p341_p10 }
  0x20   :  { %351 = shalt.err (!%p348_p0)
}
  0x21   :  { %s403_s1 = smov 128   ;;  %s404_s6 = smov 8  }
  0x22   :  { %45 = dma.hbm_to_vmem [thread:$0]  %s459_s2, 512, %s40_s29, [#allocation6], %s403_s1, %s403_s1, %s404_s6  }
  0x23   :  { %s405_s9 = smov [#allocation8]  }
  0x24   :  { %s51_s10 = sshll.u32 %s405_s9, 4  ;;  %s52_s10 = int_to_ptr.vmem [resolvable:$true] %s51_s10 }
  0x25   :  { %s360_s0 = scalar_lea.vmem %s52_s10, 256  ;;  %p365_p2 = scmp.lt.s32.totalorder %s52_s10, %s52_s10 }
  0x26   :  { %p361_p1 = scmp.ne.s32.totalorder %s52_s10, %s360_s0  ;;  %p366_p3 = scmp.lt.s32.totalorder %s360_s0, %s360_s0 }
  0x28   :  { %p367_p4 = por %p366_p3, %p365_p2 }
  0x2a   :  { %p368_p5 = pnand %p367_p4, %p361_p1 }
  0x2c   :  { %371 = shalt.err (!%p368_p5)
}
  0x2d   :  { %57 = dma.hbm_to_vmem [thread:$0]  %s460_s3, 256, %s52_s10, [#allocation9], %s403_s1, %s403_s1, %s404_s6  }
  0x2e   :  { %392 = dma.done.wait [#allocation3], 128  }
  0x2f   :  { %393 = vsyncadd [#allocation3], 4294967168 }
  0x30   :  { %394 = dma.done.wait [#allocation6], 640  }
  0x31   :  { %395 = vsyncadd [#allocation6], 4294966656 }
  0x32   :  { %396 = dma.done.wait [#allocation9], 256  }
  0x33   :  { %397 = vsyncadd [#allocation9], 4294967040  ;;  %v406_v0 = vmov 0.0   ;;  %vm407_vm0 = vmmov 0   ;;  %v76_v1 = vld [vmem:[#allocation7 + $0x18] sm:$0xff]  ;;  %v79_v2 = vld [vmem:[#allocation8 + $0x8] sm:$0xff] }
  0x34   :  { %272 = vmatprep.subr.mxu1 %v406_v0  ;;  %265 = vmatprep.subr.mxu0 %v406_v0  ;;  %v75_v3 = vld [vmem:[#allocation7 + $0x10] sm:$0xff]  ;;  %v78_v4 = vld [vmem:[#allocation8] sm:$0xff]  ;;  %v77_v5 = vld [vmem:[#allocation5] sm:$0xff]  ;;  %vm80_vm1 = vcmask 130048   ;;  %vm154_vm2 = vcmask 261120   ;;  %s408_s13 = smov [#allocation10]  }
  0x35   :  { %269 = vmatprep.mubr.msk.f32.mxu0 %vm407_vm0, %v406_v0  ;;  %280 = vmatprep.mubr.msk.f32.mxu1 %vm407_vm0, %v406_v0  ;;  %v74_v6 = vld [vmem:[#allocation7 + $0x8] sm:$0xff]  ;;  %v73_v7 = vld [vmem:[#allocation7] sm:$0xff]  ;;  %v72_v8 = vld [vmem:[#allocation2] sm:$0xff]  ;;  %s243_s14 = sshll.u32 %s408_s13, 4  ;;  %s244_s14 = int_to_ptr.vmem [resolvable:$true] %s243_s14 }
  0x36   :  { %273 = vmatpush3.msra.mxu1 %v76_v1  ;;  %266 = vmatpush3.msra.mxu0 %v79_v2  ;;  %v256_v12 = vld [vmem:[%s461_s4] ss:$0 sm:$0xff]  ;;  %s372_s15 = scalar_lea.vmem %s244_s14, 128  ;;  %p377_p7 = scmp.lt.s32.totalorder %s244_s14, %s244_s14 }
  0x37   :  { %274 = vmatprep.subr.mxu1 %v406_v0  ;;  %267 = vmatprep.subr.mxu0 %v406_v0  ;;  %p373_p6 = scmp.ne.s32.totalorder %s244_s14, %s372_s15  ;;  %p378_p8 = scmp.lt.s32.totalorder %s372_s15, %s372_s15 }
  0x38   :  { %275 = vmatpush3.msra.mxu1 %v75_v3  ;;  %268 = vmatpush3.msra.mxu0 %v78_v4 }
  0x39   :  { %276 = vmatprep.subr.mxu1 %v406_v0  ;;  %270 = vmatmul.mubr.msk.f32.vlgmr.msra.gmra.mxu0 %vm80_vm1, %v77_v5  ;;  %p379_p9 = por %p378_p8, %p377_p7 }
  0x3a   :  { %277 = vmatpush3.msra.mxu1 %v74_v6 }
  0x3b   :  { %278 = vmatprep.subr.mxu1 %v406_v0  ;;  %p380_p10 = pnand %p379_p9, %p373_p6 }
  0x3c   :  { %279 = vmatpush3.msra.mxu1 %v73_v7 }
  0x3d   :  { %281 = vmatmul.mubr.msk.f32.vlgmr.msra.gmra.mxu1 %vm154_vm2, %v72_v8 }
  0xf9   :  { %v150_v9 = vpop.f32.mrf.mxu0 }
  0xfb   :  { %v271_v10 = vpop.f32.mrf.mxu0 }
  0xfd   :  { %v224_v11 = vpop.f32.mrf.mxu1 }
  0xfe   :  { %v225_v13 = vadd.f32 %v224_v11, %v150_v9 }
  0xff   :  { %v282_v14 = vpop.f32.mrf.mxu1 }
 0x100   :  { %v235_v15 = vadd.f32 %v256_v12, %v225_v13 }
 0x102   :  { %236 = vst.msk [vmem:[#allocation10] sm:$0xff] %vm154_vm2, %v235_v15 }
 0x103   :  { %383 = shalt.err (!%p380_p10)
}
 0x104   :  { %246 = dma.vmem_to_hbm [thread:$0]  %s244_s14, 128, %s462_s5, [#allocation4]  }
 0x105   :  { %398 = dma.done.wait [#allocation4], 128  }
 0x106   :  { %399 = vsyncadd [#allocation4], 4294967168 }
 0x107   :  { %250 = vsyncpa [#allocation3], 1 }
 0x108   :  { %251 = vsyncpa [#allocation6], 1 }
 0x109   :  { %252 = vsyncpa [#allocation9], 1 }
 0x10a   :  { %253 = vsyncpa [#allocation4], 1 }

</bundles_post_ra>
